<compile_context>
chip_gen: v7x
topology: tpu7x:2x2x1
jax: 0.10.0
libtpu: 0.0.40
codegen_flags: <defaults>
</compile_context>

<pallas_src>
import functools

import jax
import jax.numpy as jnp
from jax.experimental import pallas as pl
from jax.experimental.pallas import tpu as pltpu

LN_EPS = 1e-5


def _round_up(x, m):
    return (x + m - 1) // m * m


def critic_head_kernel(x_ref, w1_ref, p_ref, o_ref, *, inv_n):
    """One batch tile of the fused CriticHead forward.

    x_ref : [TILE_B, D]     activations (f32 or bf16)
    w1_ref: [D, H1p]        layer-1 weight, H1 zero-padded to a lane multiple
    p_ref : [5, H1p]  f32   rows: b1, ln_gamma, ln_beta, fused w2' row, fused b2'
    o_ref : [1, TILE_B] f32 lane-dense output row
    inv_n : 1 / true_H1     (LayerNorm normalizer uses the unpadded width)
    """
    # ---- MLP layer 1: Linear on the MXU, f32 accumulate ----
    h = jnp.dot(x_ref[...], w1_ref[...], preferred_element_type=jnp.float32)
    h = h + p_ref[0:1, :]

    # ---- LayerNorm: single-pass stats (sum & sum-of-squares), biased var ----
    # Padded lanes are exactly 0 (zero w1 cols, zero b1 pad) and so contribute 0
    # to s1/s2; dividing by the true H1 keeps the statistics bit-exact.
    s1 = jnp.sum(h, axis=-1, keepdims=True)
    s2 = jnp.sum(h * h, axis=-1, keepdims=True)
    mu = s1 * inv_n
    var = jnp.maximum(s2 * inv_n - mu * mu, 0.0)
    h = (h - mu) * jax.lax.rsqrt(var + LN_EPS)
    h = h * p_ref[1:2, :] + p_ref[2:3, :]          # padded lanes: gamma=beta=0 -> 0

    # ---- SiLU (sigmoid on the EUP, multiply on the VPU) ----
    h = h * jax.nn.sigmoid(h)                      # SiLU(0) = 0 on padded lanes

    # ---- Fused (layer 2 ∘ head): single [1, H1p] row contraction ----
    # 'oh,bh->ob' contracts the last dims (q@k^T pattern) -> lane-dense [1, TILE_B]
    # straight out of the MXU, no relayout and no N=1 result column.
    out_row = jnp.einsum(
        "oh,bh->ob", p_ref[3:4, :], h, preferred_element_type=jnp.float32
    )
    o_ref[...] = (out_row + p_ref[4:5, 0:1]).astype(o_ref.dtype)


def fuse_params(params, matmul_dtype=None):
    """Fold the output head into MLP layer 2, pack row params, pad H1 to 128.

    Exact: no nonlinearity between the last MLP Linear and the head, so
        (h @ w2 + b2) @ wo + bo == h @ (w2 @ wo) + (b2 @ wo + bo).
    Returns {"w1": [D, H1p], "pvec": [5, H1p] f32, "true_h1": H1}.
    """
    w1 = params["w1"].astype(jnp.float32)
    D, H1 = w1.shape
    H1p = _round_up(H1, 128)

    w2p = (params["w2"] @ params["wo"]).reshape(1, H1).astype(jnp.float32)   # [1, H1]
    b2p = (params["b2"] @ params["wo"] + params["bo"]).astype(jnp.float32)   # [1, 1]

    def pad_row(r):
        r = jnp.asarray(r, jnp.float32).reshape(1, H1)
        return jnp.pad(r, ((0, 0), (0, H1p - H1)))

    pvec = jnp.concatenate(
        [
            pad_row(params["b1"]),
            pad_row(params["ln1_g"]),
            pad_row(params["ln1_b"]),
            pad_row(w2p),
            jnp.broadcast_to(b2p, (1, H1p)),
        ],
        axis=0,
    )

    w1 = jnp.pad(w1, ((0, 0), (0, H1p - H1)))
    if matmul_dtype is not None:
        w1 = w1.astype(matmul_dtype)
    return {"w1": w1, "pvec": pvec, "true_h1": H1}


def _vmem_capacity_bytes():
    try:
        return int(pltpu.get_tpu_info().vmem_capacity_bytes)
    except Exception:
        return 64 * 1024 * 1024  # conservative (v7x physical VMEM per TC)


def critic_head_forward(x, fused, *, max_tile_b=1024):
    """Fused CriticHead forward. Returns [B, 1] float32 (same as the torch module)."""
    w1 = fused["w1"]
    pvec = fused["pvec"]
    true_h1 = int(fused["true_h1"])
    B, D = x.shape
    H1p = w1.shape[1]

    # bf16 matmul path only when x already arrives in bf16 from its producer.
    # Never rewrite x in HBM; cast the (small) weight instead.
    if w1.dtype != x.dtype:
        w1 = w1.astype(x.dtype)

    in_itemsize = jnp.dtype(x.dtype).itemsize
    out_dtype = jnp.float32
    out_itemsize = jnp.dtype(out_dtype).itemsize

    # ---- Batch tile selection ----
    #  * tiny B: one (ragged) tile, rounded to the sublane multiple of 8
    #  * mid B : >= 2 tiles (lane-dense multiples of 128) so the "parallel"
    #            batch axis shards across v7x's two TensorCores
    #  * big B : max_tile_b-row tiles
    if B <= 128:
        tile_b = _round_up(B, 8)
    elif B <= max_tile_b:
        tile_b = min(_round_up(pl.cdiv(B, 2), 128), max_tile_b)
    else:
        tile_b = max_tile_b

    # ---- VMEM budget (v7x: 64 MiB physical; v5e/v6e: 128 MiB) ----
    vmem_cap = _vmem_capacity_bytes()
    vmem_budget = max(vmem_cap - 16 * 1024 * 1024, 16 * 1024 * 1024)

    def vmem_bytes(tb):
        return (
            2 * tb * D * in_itemsize        # double-buffered x tile
            + 2 * D * H1p * in_itemsize     # resident weight (count 2 buffers, safe)
            + 2 * 5 * H1p * 4               # packed params
            + 2 * tb * out_itemsize         # output row
        )

    while vmem_bytes(tile_b) > vmem_budget and tile_b > 128:
        tile_b = max(128, tile_b // 2)

    num_tiles = pl.cdiv(B, tile_b)
    b_pad = num_tiles * tile_b              # only the tiny output is lane-padded

    cost = pl.CostEstimate(
        flops=2 * B * D * H1p + 12 * B * H1p,
        transcendentals=B * H1p,
        bytes_accessed=B * D * in_itemsize + D * H1p * in_itemsize
        + 5 * H1p * 4 + b_pad * out_itemsize,
    )

    vmem_limit = min(vmem_budget, max(vmem_bytes(tile_b) + 8 * 1024 * 1024,
                                      32 * 1024 * 1024))

    kernel = functools.partial(critic_head_kernel, inv_n=1.0 / float(true_h1))

    out = pl.pallas_call(
        kernel,
        out_shape=jax.ShapeDtypeStruct((1, b_pad), out_dtype),
        grid=(num_tiles,),
        in_specs=[
            pl.BlockSpec((tile_b, D), lambda i: (i, 0)),   # streamed x (ragged last block OK)
            pl.BlockSpec((D, H1p), lambda i: (0, 0)),      # VMEM-resident weight
            pl.BlockSpec((5, H1p), lambda i: (0, 0)),      # VMEM-resident packed params
        ],
        out_specs=pl.BlockSpec((1, tile_b), lambda i: (0, i)),  # lane-dense output
        compiler_params=pltpu.CompilerParams(
            dimension_semantics=("parallel",),             # megacore-shardable batch axis
            vmem_limit_bytes=int(vmem_limit),
        ),
        cost_estimate=cost,
    )(x, w1, pvec)

    # [1, b_pad] lane-dense row -> [B, 1] f32 (tail garbage from ragged block dropped).
    return out.reshape(b_pad, 1)[:B]


def make_params(key, input_dim, hidden_dims):
    """Deterministic synthetic parameter init (shapes match the torch module).

    Linear weights stored transposed vs. PyTorch, i.e. [in, out].
    """
    h1, h2 = hidden_dims
    ks = jax.random.split(key, 6)
    w1 = jax.random.normal(ks[0], (input_dim, h1), jnp.float32) * (1.0 / jnp.sqrt(input_dim))
    b1 = jax.random.normal(ks[1], (1, h1), jnp.float32) * 0.01
    ln1_g = jnp.ones((1, h1), jnp.float32)
    ln1_b = jnp.zeros((1, h1), jnp.float32)
    w2 = jax.random.normal(ks[2], (h1, h2), jnp.float32) * (1.0 / jnp.sqrt(h1))
    b2 = jax.random.normal(ks[3], (1, h2), jnp.float32) * 0.01
    # Output layer: orthogonal init of a [1, h2] torch weight == unit-norm row.
    wo_row = jax.random.normal(ks[4], (h2,), jnp.float32)
    wo_row = wo_row / jnp.linalg.norm(wo_row)
    wo = wo_row.reshape(h2, 1)                     # stored as [in, out]
    bo = jax.random.normal(ks[5], (1, 1), jnp.float32) * 0.01
    return {
        "w1": w1, "b1": b1, "ln1_g": ln1_g, "ln1_b": ln1_b,
        "w2": w2, "b2": b2, "wo": wo, "bo": bo,
    }


def reference_forward(x, p):
    """Pure-JAX reference mirroring the PyTorch forward (unfused, unpadded)."""
    h = x @ p["w1"] + p["b1"]
    mu = jnp.mean(h, axis=-1, keepdims=True)
    var = jnp.mean((h - mu) ** 2, axis=-1, keepdims=True)
    h = (h - mu) / jnp.sqrt(var + LN_EPS) * p["ln1_g"] + p["ln1_b"]
    h = h * jax.nn.sigmoid(h)
    h = h @ p["w2"] + p["b2"]
    return h @ p["wo"] + p["bo"]


if __name__ == "__main__":
    INPUT_DIM = 32
    HIDDEN_DIMS = [32, 32]

    key = jax.random.PRNGKey(0)
    kx, kp, kx2 = jax.random.split(key, 3)
    params = make_params(kp, INPUT_DIM, HIDDEN_DIMS)
    fused = fuse_params(params)

    # --- small batch (B=2), f32 path: ragged single tile, exact vs reference ---
    B = 2
    x = jax.random.normal(kx, (B, INPUT_DIM), jnp.float32)
    ref = reference_forward(x, params)
    out = jax.block_until_ready(critic_head_forward(x, fused))
    assert out.shape == (B, 1), out.shape
    assert out.dtype == jnp.float32
    assert jnp.allclose(out, ref, atol=5e-4, rtol=5e-4), (out, ref)

    # --- misaligned mid batch (B=300): >=2 lane-dense tiles + ragged last block ---
    B2 = 300
    x2 = jax.random.normal(kx2, (B2, INPUT_DIM), jnp.float32)
    ref2 = reference_forward(x2, params)
    out2 = jax.block_until_ready(critic_head_forward(x2, fused))
    assert out2.shape == (B2, 1), out2.shape
    assert jnp.allclose(out2, ref2, atol=5e-4, rtol=5e-4)

    # --- bf16 matmul path: only when x itself arrives in bf16 (no wrapper cast of
    #     a f32 x); LN/SiLU/accumulation stay f32 inside the kernel, output is f32. ---
    fused_bf16 = fuse_params(params, matmul_dtype=jnp.bfloat16)
    x_bf16 = x.astype(jnp.bfloat16)   # simulates a producer that emits bf16
    out_bf16 = jax.block_until_ready(critic_head_forward(x_bf16, fused_bf16))
    assert out_bf16.shape == (B, 1), out_bf16.shape
    assert out_bf16.dtype == jnp.float32
    assert jnp.all(jnp.isfinite(out_bf16))
    assert jnp.allclose(out_bf16, ref, atol=0.1, rtol=0.1), (out_bf16, ref)

    print("KERNEL_OK")
</pallas_src>

<mosaic_0001>
module attributes {stable_mosaic.version = 11 : i64} {
  func.func @critic_head_kernel(%arg0: i32, %arg1: memref<8x32xf32, #tpu.memory_space<vmem>>, %arg2: memref<32x128xf32, #tpu.memory_space<vmem>>, %arg3: memref<5x128xf32, #tpu.memory_space<vmem>>, %arg4: memref<1x8xf32, #tpu.memory_space<vmem>>) attributes {dimension_semantics = [#tpu.dimension_semantics<parallel>], iteration_bounds = array<i64: 1>, scalar_prefetch = 0 : i64, scratch_operands = 0 : i64, tpu.core_type = #tpu.core_type<tc>, window_params = [{transform_indices = @transform_0, window_bounds = array<i64: 8, 32>}, {pipeline_mode = #tpu.pipeline_mode<synchronous>, transform_indices = @transform_1, window_bounds = array<i64: 32, 128>}, {pipeline_mode = #tpu.pipeline_mode<synchronous>, transform_indices = @transform_2, window_bounds = array<i64: 5, 128>}, {transform_indices = @transform_3, window_bounds = array<i64: 1, 8>}]} {
    %c0 = arith.constant 0 : index
    %c0_0 = arith.constant 0 : index
    %0 = vector.load %arg1[%c0, %c0_0] : memref<8x32xf32, #tpu.memory_space<vmem>>, vector<8x32xf32>
    %c0_1 = arith.constant 0 : index
    %c0_2 = arith.constant 0 : index
    %1 = vector.load %arg2[%c0_1, %c0_2] : memref<32x128xf32, #tpu.memory_space<vmem>>, vector<32x128xf32>
    %cst = arith.constant dense<0.000000e+00> : vector<8x128xf32>
    %2 = tpu.matmul %0, %1, %cst {dimension_numbers = #tpu.dot_dimension_numbers<[1], [0], [0], [1], [0, 0, 1, 1], [], []>} : vector<8x32xf32>, vector<32x128xf32>, vector<8x128xf32> -> vector<8x128xf32>
    %c0_3 = arith.constant 0 : index
    %c0_4 = arith.constant 0 : index
    %3 = vector.load %arg3[%c0_3, %c0_4] : memref<5x128xf32, #tpu.memory_space<vmem>>, vector<1x128xf32>
    %4 = vector.broadcast %3 : vector<1x128xf32> to vector<8x128xf32>
    %5 = arith.addf %2, %4 : vector<8x128xf32>
    %cst_5 = arith.constant dense<0.000000e+00> : vector<8xf32>
    %6 = vector.multi_reduction <add>, %5, %cst_5 [1] : vector<8x128xf32> to vector<8xf32>
    %7 = vector.shape_cast %6 : vector<8xf32> to vector<8x1xf32>
    %8 = arith.mulf %5, %5 : vector<8x128xf32>
    %cst_6 = arith.constant dense<0.000000e+00> : vector<8xf32>
    %9 = vector.multi_reduction <add>, %8, %cst_6 [1] : vector<8x128xf32> to vector<8xf32>
    %10 = vector.shape_cast %9 : vector<8xf32> to vector<8x1xf32>
    %cst_7 = arith.constant 3.125000e-02 : f32
    %11 = vector.broadcast %cst_7 : f32 to vector<8x1xf32>
    %12 = arith.mulf %7, %11 : vector<8x1xf32>
    %cst_8 = arith.constant 3.125000e-02 : f32
    %13 = vector.broadcast %cst_8 : f32 to vector<8x1xf32>
    %14 = arith.mulf %10, %13 : vector<8x1xf32>
    %15 = arith.mulf %12, %12 : vector<8x1xf32>
    %16 = arith.subf %14, %15 : vector<8x1xf32>
    %cst_9 = arith.constant 0.000000e+00 : f32
    %17 = vector.broadcast %cst_9 : f32 to vector<8x1xf32>
    %18 = arith.maximumf %16, %17 : vector<8x1xf32>
    %19 = vector.broadcast %12 : vector<8x1xf32> to vector<8x128xf32>
    %20 = arith.subf %5, %19 : vector<8x128xf32>
    %cst_10 = arith.constant 9.99999974E-6 : f32
    %21 = vector.broadcast %cst_10 : f32 to vector<8x1xf32>
    %22 = arith.addf %18, %21 : vector<8x1xf32>
    %23 = math.rsqrt %22 : vector<8x1xf32>
    %24 = vector.broadcast %23 : vector<8x1xf32> to vector<8x128xf32>
    %25 = arith.mulf %20, %24 : vector<8x128xf32>
    %c1 = arith.constant 1 : index
    %c0_11 = arith.constant 0 : index
    %26 = vector.load %arg3[%c1, %c0_11] : memref<5x128xf32, #tpu.memory_space<vmem>>, vector<1x128xf32>
    %27 = vector.broadcast %26 : vector<1x128xf32> to vector<8x128xf32>
    %28 = arith.mulf %25, %27 : vector<8x128xf32>
    %c2 = arith.constant 2 : index
    %c0_12 = arith.constant 0 : index
    %29 = vector.load %arg3[%c2, %c0_12] : memref<5x128xf32, #tpu.memory_space<vmem>>, vector<1x128xf32>
    %30 = vector.broadcast %29 : vector<1x128xf32> to vector<8x128xf32>
    %31 = arith.addf %28, %30 : vector<8x128xf32>
    %32 = arith.negf %31 : vector<8x128xf32>
    %33 = math.exp %32 : vector<8x128xf32>
    %cst_13 = arith.constant 1.000000e+00 : f32
    %34 = vector.broadcast %cst_13 : f32 to vector<8x128xf32>
    %35 = arith.addf %34, %33 : vector<8x128xf32>
    %36 = arith.divf %34, %35 : vector<8x128xf32>
    %37 = arith.mulf %31, %36 : vector<8x128xf32>
    %c3 = arith.constant 3 : index
    %c0_14 = arith.constant 0 : index
    %38 = vector.load %arg3[%c3, %c0_14] : memref<5x128xf32, #tpu.memory_space<vmem>>, vector<1x128xf32>
    "tpu.trace_start"() <{level = 10 : i32, message = "oh,bh->ob"}> : () -> ()
    %cst_15 = arith.constant dense<0.000000e+00> : vector<1x8xf32>
    %39 = tpu.matmul %38, %37, %cst_15 {dimension_numbers = #tpu.dot_dimension_numbers<[1], [1], [0], [0], [0, 0, 1, 0], [], []>} : vector<1x128xf32>, vector<8x128xf32>, vector<1x8xf32> -> vector<1x8xf32>
    "tpu.trace_stop"() : () -> ()
    %c4 = arith.constant 4 : index
    %c0_16 = arith.constant 0 : index
    %40 = vector.load %arg3[%c4, %c0_16] : memref<5x128xf32, #tpu.memory_space<vmem>>, vector<1x1xf32>
    %41 = vector.broadcast %40 : vector<1x1xf32> to vector<1x8xf32>
    %42 = arith.addf %39, %41 : vector<1x8xf32>
    %c0_17 = arith.constant 0 : index
    %c0_18 = arith.constant 0 : index
    %43 = vector.load %arg4[%c0_17, %c0_18] : memref<1x8xf32, #tpu.memory_space<vmem>>, vector<1x8xf32>
    tpu.vector_store %arg4[%c0_17, %c0_18], %42 {strides = array<i32>} : memref<1x8xf32, #tpu.memory_space<vmem>>, vector<1x8xf32>,
    return
  }
  func.func @transform_0(%arg0: i32) -> (i32, i32) {
    %c0_i32 = arith.constant 0 : i32
    %c0_i32_0 = arith.constant 0 : i32
    return %arg0, %c0_i32 : i32, i32
  }
  func.func @transform_1(%arg0: i32) -> (i32, i32) {
    %c0_i32 = arith.constant 0 : i32
    %c0_i32_0 = arith.constant 0 : i32
    %c0_i32_1 = arith.constant 0 : i32
    return %c0_i32, %c0_i32_0 : i32, i32
  }
  func.func @transform_2(%arg0: i32) -> (i32, i32) {
    %c0_i32 = arith.constant 0 : i32
    %c0_i32_0 = arith.constant 0 : i32
    %c0_i32_1 = arith.constant 0 : i32
    return %c0_i32, %c0_i32_0 : i32, i32
  }
  func.func @transform_3(%arg0: i32) -> (i32, i32) {
    %c0_i32 = arith.constant 0 : i32
    %c0_i32_0 = arith.constant 0 : i32
    return %c0_i32, %arg0 : i32, i32
  }
}

</mosaic_0001>

<bundles_post_ra>
// kernel: tpu_custom_call.1
= control target key start
LH: loop header
LB: loop body
LE: loop exit
PB: predicated region body
PF: predicated region fallthrough
CT: control target
= control target key end

     0   :  { %8 = vsyncpa [#allocation3], 0  ;;  %s494_s0 = inlined_call_operand.hbm [shape: f32[2,32], index: 0, kind: input, shape index: {}]   ;;  %s495_s1 = inlined_call_operand.hbm [shape: f32[32,128], index: 1, kind: input, shape index: {}]   ;;  %s496_s2 = inlined_call_operand.hbm [shape: f32[5,128], index: 2, kind: input, shape index: {}]   ;;  %s497_s3 = inlined_call_operand.hbm [shape: f32[1,8], index: 3, kind: output, shape index: {}]  }
   0x1   :  { %9 = vsyncpa [#allocation6], 0 }
   0x2   :  { %10 = vsyncpa [#allocation4], 0 }
   0x3   :  { %15 = vsyncadd [#allocation3], 96  ;;  %s414_s12 = smov [#allocation5]   ;;  %s320_s16 = scalar_lea.hbm %s495_s1, 512 }
   0x4   :  { %s28_s13 = sshll.u32 %s414_s12, 4  ;;  %p321_p0 = scmp.ne.s32.totalorder %s495_s1, %s320_s16  ;;  %s29_s13 = int_to_ptr.vmem [resolvable:$true] %s28_s13 }
   0x5   :  { %p324_p1 = scmp.lt.u32.totalorder %s320_s16, %s495_s1 }
   0x7   :  { %p326_p2 = pnand %p324_p1, %p321_p0 }
   0x9   :  { %329 = shalt.err (!%p326_p2)
}
   0xa   :  { %s330_s21 = scalar_lea.vmem %s29_s13, 512  ;;  %p335_p4 = scmp.lt.s32.totalorder %s29_s13, %s29_s13 }
   0xb   :  { %p331_p3 = scmp.ne.s32.totalorder %s29_s13, %s330_s21  ;;  %p336_p5 = scmp.lt.s32.totalorder %s330_s21, %s330_s21 }
   0xd   :  { %p337_p6 = por %p336_p5, %p335_p4 }
   0xf   :  { %p338_p7 = pnand %p337_p6, %p331_p3 }
  0x11   :  { %341 = shalt.err (!%p338_p7)
}
  0x12   :  { %s415_s22 = smov 128   ;;  %s416_s23 = smov 8  }
  0x13   :  { %34 = dma.hbm_to_vmem [thread:$0]  %s495_s1, 512, %s29_s13, [#allocation6], %s415_s22, %s415_s22, %s416_s23  }
  0x14   :  { %s417_s26 = smov [#allocation2]   ;;  %s342_s30 = scalar_lea.hbm %s494_s0, 32 }
  0x15   :  { %s16_s27 = sshll.u32 %s417_s26, 4  ;;  %p343_p8 = scmp.ne.s32.totalorder %s494_s0, %s342_s30  ;;  %s17_s27 = int_to_ptr.vmem [resolvable:$true] %s16_s27 }
  0x16   :  { %p346_p9 = scmp.lt.u32.totalorder %s342_s30, %s494_s0 }
  0x18   :  { %p348_p10 = pnand %p346_p9, %p343_p8 }
  0x1a   :  { %351 = shalt.err (!%p348_p10)
}
  0x1b   :  { %s352_s8 = scalar_lea.vmem %s17_s27, 32  ;;  %s356_s1 = scalar_lea.vmem %s17_s27, 128 }
  0x1c   :  { %p353_p11 = scmp.ne.s32.totalorder %s17_s27, %s352_s8  ;;  %p357_p12 = scmp.lt.s32.totalorder %s17_s27, %s17_s27 }
  0x1d   :  { %p358_p13 = scmp.lt.s32.totalorder %s356_s1, %s352_s8 }
  0x1f   :  { %p359_p0 = por %p358_p13, %p357_p12 }
  0x21   :  { %p360_p1 = pnand %p359_p0, %p353_p11 }
  0x23   :  { %363 = shalt.err (!%p360_p1)
}
  0x24   :  { %s418_s9 = smov 32   ;;  %s419_s10 = smov 2  }
  0x25   :  { %22 = dma.hbm_to_vmem [thread:$0]  %s494_s0, 32, %s17_s27, [#allocation3], %s418_s9, %s418_s9, %s419_s10  }
  0x26   :  { %s420_s13 = smov [#allocation7]   ;;  %s364_s17 = scalar_lea.hbm %s496_s2, 128 }
  0x27   :  { %s41_s14 = sshll.u32 %s420_s13, 4  ;;  %p365_p2 = scmp.ne.s32.totalorder %s496_s2, %s364_s17  ;;  %s42_s14 = int_to_ptr.vmem [resolvable:$true] %s41_s14 }
  0x28   :  { %p368_p3 = scmp.lt.u32.totalorder %s364_s17, %s496_s2 }
  0x2a   :  { %p370_p4 = pnand %p368_p3, %p365_p2 }
  0x2c   :  { %373 = shalt.err (!%p370_p4)
}
  0x2d   :  { %s374_s22 = scalar_lea.vmem %s42_s14, 128  ;;  %p379_p6 = scmp.lt.s32.totalorder %s42_s14, %s42_s14 }
  0x2e   :  { %p375_p5 = scmp.ne.s32.totalorder %s42_s14, %s374_s22  ;;  %p380_p7 = scmp.lt.s32.totalorder %s374_s22, %s374_s22 }
  0x30   :  { %p381_p8 = por %p380_p7, %p379_p6 }
  0x32   :  { %p382_p9 = pnand %p381_p8, %p375_p5 }
  0x34   :  { %385 = shalt.err (!%p382_p9)
}
  0x35   :  { %44 = dma.hbm_to_vmem [thread:$0]  %s496_s2, 128, %s42_s14, [#allocation6]  }
  0x36   :  { %408 = dma.done.wait [#allocation3], 128  }
  0x37   :  { %409 = vsyncadd [#allocation3], 4294967168 }
  0x38   :  { %410 = dma.done.wait [#allocation6], 640  }
  0x39   :  { %411 = vsyncadd [#allocation6], 4294966656  ;;  %v421_v0 = vmov 0.0|0.0   ;;  %vm422_vm0 = vmmov 0   ;;  %v423_v1 = vmov 0.0   ;;  %v55_v2 = vld [vmem:[#allocation5] sm:$0xff] }
  0x3a   :  { %294 = vmatprep.subr.bf16.mxu0 %v421_v0  ;;  %286 = vmatprep.mubr.msk.f32.mxu0 %vm422_vm0, %v423_v1  ;;  %v56_v3 = vld [vmem:[#allocation5 + $0x8] sm:$0xff]  ;;  %v57_v4 = vld [vmem:[#allocation5 + $0x10] sm:$0xff]  ;;  %v58_v6 = vld [vmem:[#allocation5 + $0x18] sm:$0xff]  ;;  %vm64_vm1 = vcmask 261120   ;;  %v424_v15 = vmov 0   ;;  %s425_s2 = smov [#allocation8]  }
  0x3b   :  { %289 = vmatprep.subr.mxu1 %v423_v1  ;;  %291 = vmatprep.mubr.msk.f32.mxu1 %vm422_vm0, %v423_v1  ;;  %v295_v5 = vpack.c.bf16 %v56_v3, %v55_v2  ;;  %v298_v7 = vpack.c.bf16 %v58_v6, %v57_v4  ;;  %v54_v8 = vld [vmem:[#allocation2] sm:$0xff]  ;;  %v266_v9 = vld [vmem:[#allocation7] ss:$0 sm:$0xff]  ;;  %v172_v14 = vld [vmem:[#allocation7 + $0x4] sm:$0x1]  ;;  %s256_s24 = sshll.u32 %s425_s2, 4  ;;  %s257_s24 = int_to_ptr.vmem [resolvable:$true] %s256_s24 }
  0x3c   :  { %312 = vset.pattern.permute.xlu1 %v424_v15  ;;  %313 = vset.pattern.permute.xlu0 %v424_v15  ;;  %v268_v26 = vld [vmem:[#allocation7 + $0x1] ss:$0 sm:$0xff]  ;;  %v269_v28 = vld [vmem:[#allocation7 + $0x2] ss:$0 sm:$0xff]  ;;  %v171_v36 = vld [vmem:[#allocation7 + $0x3] sm:$0x1]  ;;  %p391_p11 = scmp.lt.s32.totalorder %s257_s24, %s257_s24 }
  0x3d   :  { %296 = vmatpush3.bf16.msra.mxu0 %v295_v5  ;;  %175 = vperm.xlu1 %312, %v172_v14   ;;  %vm248_vm2 = vcmask 57344   ;;  %s386_s25 = scalar_lea.vmem %s257_s24, 16  ;;  %s390_s26 = scalar_lea.vmem %s257_s24, 32 }
  0x3e   :  { %297 = vmatprep.subr.bf16.mxu0 %v421_v0  ;;  %p387_p10 = scmp.ne.s32.totalorder %s257_s24, %s386_s25  ;;  %p392_p12 = scmp.lt.s32.totalorder %s390_s26, %s386_s25 }
  0x40   :  { %p393_p13 = por %p392_p12, %p391_p11 }
  0x41   :  { %299 = vmatpush3.bf16.msra.mxu0 %v298_v7 }
  0x42   :  { %p394_p0 = pnand %p393_p13, %p387_p10 }
  0x44   :  { %287 = vmatmul.mubr.msk.f32.vlgmr.msra.gmra.mrb[0].mxu0 %vm64_vm1, %v54_v8 }
  0xbc   :  { %v176_v37 = vpop.permute.xlu1 %175 }
 0x117   :  { %v134_v10 = vpop.f32.mrb[0].mxu0 }
 0x118   :  { %v135_v11 = vadd.f32 %v266_v9, %v134_v10  ;;  %v288_v12 = vpop.f32.mrb[1].mxu0 }
 0x11a   :  { %138 = vadd.xlane.f32.xlu0 %v135_v11  ;;  %v140_v13 = vmul.f32 %v135_v11, %v135_v11 }
 0x11e   :  { %141 = vadd.xlane.f32.xlu0 %v140_v13 }
 0x1a7   :  { %v139_v16 = vpop.xlane.xlu0 %138 }
 0x1a8   :  { %v143_v17 = vmul.f32 0.03125, %v139_v16 }
 0x1aa   :  { %v145_v19 = vmul.f32 %v143_v17, %v143_v17  ;;  %v148_v24 = vsub.f32 %v135_v11, %v143_v17 }
 0x1ab   :  { %v142_v18 = vpop.xlane.xlu0 %141 }
 0x1ac   :  { %v144_v20 = vmul.f32 0.03125, %v142_v18 }
 0x1ae   :  { %v146_v21 = vsub.f32 %v144_v20, %v145_v19 }
 0x1b0   :  { %v147_v22 = vmax.f32 %v146_v21, 0.0 }
 0x1b2   :  { %v149_v23 = vadd.f32 1e-05, %v147_v22 }
 0x1b4   :  { %314 = vrsqrt.f32 %v149_v23 }
 0x1be   :  { %v315_v25 = vpop.eup %314 }
 0x1bf   :  { %v151_v27 = vmul.f32 %v315_v25, %v148_v24 }
 0x1c1   :  { %v157_v29 = vmul.f32 %v268_v26, %v151_v27 }
 0x1c3   :  { %v163_v30 = vadd.f32 %v269_v28, %v157_v29 }
 0x1c5   :  { %v270_v31 = vmul.f32 -1.442695, %v163_v30 }
 0x1c7   :  { %316 = vpow2.f32 %v270_v31 }
 0x1d1   :  { %v317_v32 = vpop.eup %316 }
 0x1d2   :  { %v167_v33 = vadd.f32 1.0, %v317_v32 }
 0x1d4   :  { %318 = vrcp.f32 %v167_v33 }
 0x1de   :  { %v319_v34 = vpop.eup %318 }
 0x1df   :  { %v170_v35 = vmul.f32 %v319_v34, %v163_v30 }
 0x1e1   :  { %290 = vmatpush3.xpose.msra.mxu1 %v170_v35 }
 0x1e4   :  { %292 = vmatmul.mubr.f32.vlgmr.msra.gmra.mrb[0].mxu1 %v171_v36 }
 0x2b7   :  { %v244_v38 = vpop.f32.mrb[0].mxu1 }
 0x2b8   :  { %v245_v39 = vadd.f32 %v244_v38, %v176_v37  ;;  %v293_v40 = vpop.f32.mrb[1].mxu1 }
 0x2ba   :  { %249 = vst.msk [vmem:[#allocation8] sm:$0x1] %vm248_vm2, %v245_v39 }
 0x2bb   :  { %397 = shalt.err (!%p394_p0)
}
 0x2bc   :  { %s398_s29 = scalar_lea.hbm %s497_s3, 16 }
 0x2bd   :  { %p399_p1 = scmp.ne.s32.totalorder %s497_s3, %s398_s29  ;;  %p402_p2 = scmp.lt.u32.totalorder %s398_s29, %s497_s3 }
 0x2bf   :  { %p404_p3 = pnand %p402_p2, %p399_p1 }
 0x2c1   :  { %407 = shalt.err (!%p404_p3)
}
 0x2c2   :  { %259 = dma.vmem_to_hbm [thread:$0]  %s257_s24, 16, %s497_s3, [#allocation4]  }
 0x2c3   :  { %412 = dma.done.wait [#allocation4], 16  }
 0x2c4   :  { %413 = vsyncadd [#allocation4], 4294967280 }
 0x2c5   :  { %263 = vsyncpa [#allocation3], 1 }
 0x2c6   :  { %264 = vsyncpa [#allocation6], 1 }
 0x2c7   :  { %265 = vsyncpa [#allocation4], 1 }

</bundles_post_ra>
